<compile_context>
chip_gen: v5e
topology: v5e:2x2
jax: 0.10.0
libtpu: 0.0.40
codegen_flags: <defaults>
</compile_context>

<pallas_src>
import functools
import math

import jax
import jax.numpy as jnp
from jax.experimental import pallas as pl
from jax.experimental.pallas import tpu as pltpu


def _relu6(x):
    return jnp.clip(x, 0.0, 6.0)


def _round_up(x, m):
    return ((x + m - 1) // m) * m


def _pad2d(arr, rows=None, cols=None):
    r, c = arr.shape
    rp = 0 if rows is None else rows - r
    cp = 0 if cols is None else cols - c
    if rp == 0 and cp == 0:
        return arr
    return jnp.pad(arr, ((0, rp), (0, cp)))


def _device_kind():
    try:
        return jax.devices()[0].device_kind.lower()
    except Exception:
        return ""


def _default_tm():
    # v7x has 64 MiB VMEM -> keep tiles <= 256; v5e/v6e (128 MiB) amortize
    # per-grid-step overhead better with larger batch tiles.
    return 256 if "v7" in _device_kind() else 512


def _choose_batch_tile(batch, tm_max, min_tiles=2):
    """Pick (tm_eff, n_tiles, batch_pad) dividing the batch tightly."""
    batch8 = _round_up(max(batch, 1), 8)
    n = max(-(-batch8 // tm_max), 1)
    if batch8 >= 16:
        n = max(n, min_tiles)        # give the 2nd v7x TensorCore work
    n = min(n, batch8 // 8)          # never below 8 rows per tile
    tm_eff = _round_up(-(-batch8 // n), 8)
    batch_pad = tm_eff * n
    return tm_eff, n, batch_pad


def _ae_kernel(x_ref,
               ew0, ew1, ew2, ew3, dw0, dw1, dw2, dw3,
               b_ref,
               codes_ref, decoded_ref,
               *, out_dims, compute_dtype):
    """out_dims: static output widths of the 8 Linear layers (post-padding)."""

    def bias(i):
        # (1, out_dims[i]) f32 slice of the packed bias table.
        return b_ref[i:i + 1, :out_dims[i]].astype(jnp.float32)

    def layer(h, w_ref, i, act):
        y = jnp.dot(h.astype(compute_dtype), w_ref[...],
                    preferred_element_type=jnp.float32) + bias(i)
        return _relu6(y) if act else y

    # ---------------- encoder ----------------
    h = x_ref[...].astype(jnp.float32)
    h = layer(h, ew0, 0, True)
    h = layer(h, ew1, 1, True)
    h = layer(h, ew2, 2, True)
    codes = layer(h, ew3, 3, False)
    codes_out = codes.astype(codes_ref.dtype)
    codes_ref[...] = codes_out

    # ---------------- decoder ----------------
    # Consume exactly what was stored (matches module semantics even if the
    # output dtype is lower precision than the accumulator).
    d = codes_out.astype(jnp.float32)
    d = layer(d, dw0, 4, True)
    d = layer(d, dw1, 5, True)
    d = layer(d, dw2, 6, True)
    d = layer(d, dw3, 7, False)
    decoded_ref[...] = d.astype(decoded_ref.dtype)


def ae_forward(x, params, *, compute_dtype=jnp.bfloat16, tm=None):
    """params: list of 16 arrays [ew0, eb0, ..., dw3, db3]; W as (in, out), b as (1, out)."""
    batch, data_dim = x.shape
    first_dim = params[0].shape[1]
    mid_dim = params[2].shape[1]
    final_dim = params[4].shape[1]
    code_dim = params[6].shape[1]

    # Lane-dense padding of the external feature dims.
    data_pad = _round_up(data_dim, 128)
    code_pad = _round_up(code_dim, 128)

    # ----- batch tiling -----
    if tm is None:
        tm = _default_tm()
    tm_eff, n_tiles, batch_pad = _choose_batch_tile(batch, tm)
    x_p = jnp.pad(x, ((0, batch_pad - batch), (0, data_pad - data_dim)))

    # ----- weights: pad external dims, cast to compute dtype -----
    w_list = [params[2 * i] for i in range(8)]
    w_list[0] = _pad2d(w_list[0], rows=data_pad)   # ew0: padded input rows
    w_list[3] = _pad2d(w_list[3], cols=code_pad)   # ew3: padded code columns
    w_list[4] = _pad2d(w_list[4], rows=code_pad)   # dw0: consumes padded codes
    w_list[7] = _pad2d(w_list[7], cols=data_pad)   # dw3: padded output columns
    w_list = [w.astype(compute_dtype) for w in w_list]

    # ----- biases: pack 8 vectors into one (8, max_out_pad) f32 table -----
    out_dims = (first_dim, mid_dim, final_dim, code_pad,
                final_dim, mid_dim, first_dim, data_pad)
    max_out_pad = _round_up(max(out_dims), 128)
    bias_pack = jnp.zeros((8, max_out_pad), jnp.float32)
    for i in range(8):
        b = params[2 * i + 1].reshape(-1).astype(jnp.float32)
        bias_pack = bias_pack.at[i, :b.shape[0]].set(b)

    # ----- VMEM budget (conservative: assume 2 buffers everywhere) -----
    weight_bytes = sum(int(w.size) * jnp.dtype(w.dtype).itemsize for w in w_list)
    bias_bytes = int(bias_pack.size) * 4
    io_itemsize = jnp.dtype(x.dtype).itemsize
    io_bytes = 2 * tm_eff * (2 * data_pad + code_pad) * io_itemsize  # double-buffered tiles
    needed = 2 * (weight_bytes + bias_bytes) + 2 * io_bytes
    vmem_limit = max(int(needed * 1.3) + (4 << 20), 32 << 20)
    vmem_cap = (56 << 20) if "v7" in _device_kind() else (100 << 20)
    vmem_limit = min(vmem_limit, vmem_cap)

    # ----- cost estimate (weights DMA'd once thanks to constant index_maps) -----
    flops = 2 * batch_pad * sum(int(w.shape[0]) * int(w.shape[1]) for w in w_list)
    hbm_io = (2 * batch_pad * data_pad + batch_pad * code_pad) * io_itemsize
    cost = pl.CostEstimate(flops=flops, transcendentals=0,
                           bytes_accessed=weight_bytes + bias_bytes + hbm_io)

    kernel = functools.partial(_ae_kernel, out_dims=out_dims,
                               compute_dtype=compute_dtype)

    def _const_spec(shape, mode):
        if mode is None:
            return pl.BlockSpec(shape, lambda i: (0, 0))
        return pl.BlockSpec(shape, lambda i: (0, 0), pipeline_mode=mode)

    def _make_call(weight_mode):
        in_specs = [pl.BlockSpec((tm_eff, data_pad), lambda i: (i, 0))]
        in_specs += [_const_spec(w.shape, weight_mode) for w in w_list]
        in_specs += [_const_spec(bias_pack.shape, weight_mode)]
        return pl.pallas_call(
            kernel,
            out_shape=(
                jax.ShapeDtypeStruct((batch_pad, code_pad), x.dtype),
                jax.ShapeDtypeStruct((batch_pad, data_pad), x.dtype),
            ),
            grid=(n_tiles,),
            in_specs=in_specs,
            out_specs=(
                pl.BlockSpec((tm_eff, code_pad), lambda i: (i, 0)),
                pl.BlockSpec((tm_eff, data_pad), lambda i: (i, 0)),
            ),
            compiler_params=pltpu.CompilerParams(
                dimension_semantics=("parallel",),
                vmem_limit_bytes=vmem_limit),
            cost_estimate=cost,
        )

    args = (x_p, *w_list, bias_pack)
    try:
        # Grid-invariant operands: single pipeline buffer (halves their VMEM).
        codes_p, decoded_p = _make_call(pl.Buffered(1))(*args)
    except Exception:
        # Fallback if this JAX build rejects single-buffered pipeline_mode.
        codes_p, decoded_p = _make_call(None)(*args)

    return codes_p[:batch, :code_dim], decoded_p[:batch, :data_dim]


# ----------------------------------------------------------------------------
# Parameter construction + plain-JAX reference (matches the PyTorch module).
# ----------------------------------------------------------------------------

def _init_linear(key, in_dim, out_dim, dtype=jnp.float32):
    """nn.Linear init: U(-1/sqrt(fan_in), 1/sqrt(fan_in)); W stored as (in, out)."""
    kw, kb = jax.random.split(key)
    bound = 1.0 / math.sqrt(in_dim)
    w = jax.random.uniform(kw, (in_dim, out_dim), dtype, -bound, bound)
    b = jax.random.uniform(kb, (1, out_dim), dtype, -bound, bound)
    return w, b


def make_ae_params(key, data_dim, code_dim, first_layer_dim):
    mid_layer_dim = int(first_layer_dim / 4)
    final_layer_dim = int(mid_layer_dim / 4)

    enc_dims = [(data_dim, first_layer_dim),
                (first_layer_dim, mid_layer_dim),
                (mid_layer_dim, final_layer_dim),
                (final_layer_dim, code_dim)]
    dec_dims = [(code_dim, final_layer_dim),
                (final_layer_dim, mid_layer_dim),
                (mid_layer_dim, first_layer_dim),
                (first_layer_dim, data_dim)]

    keys = jax.random.split(key, 8)
    params = []
    for k, (din, dout) in zip(keys, enc_dims + dec_dims):
        w, b = _init_linear(k, din, dout)
        params.extend([w, b])
    return params


def ae_reference(x, params):
    def lin(h, i):
        return h @ params[2 * i] + params[2 * i + 1]

    h = x
    for i in range(3):
        h = jnp.clip(lin(h, i), 0.0, 6.0)
    codes = lin(h, 3)
    d = codes
    for i in range(4, 7):
        d = jnp.clip(lin(d, i), 0.0, 6.0)
    decoded = lin(d, 7)
    return codes, decoded


if __name__ == "__main__":
    # Shapes consistent with the module: input_shape (data_dim)=32,
    # first_layer_dim=64 -> mid=16, final=4, code_dim=8, batch=8.
    batch, data_dim, code_dim, first_layer_dim = 8, 32, 8, 64

    key = jax.random.PRNGKey(0)
    kx, kp = jax.random.split(key)
    x = jax.random.normal(kx, (batch, data_dim), dtype=jnp.float32)
    params = make_ae_params(kp, data_dim, code_dim, first_layer_dim)

    ref_codes, ref_decoded = ae_reference(x, params)

    # ---- f32 path: exact semantics, tight tolerance ----
    codes32, dec32 = ae_forward(x, params, compute_dtype=jnp.float32)
    jax.block_until_ready((codes32, dec32))
    assert codes32.shape == (batch, code_dim)
    assert dec32.shape == (batch, data_dim)
    assert jnp.allclose(codes32, ref_codes, atol=1e-5, rtol=1e-5)
    assert jnp.allclose(dec32, ref_decoded, atol=1e-5, rtol=1e-5)

    # ---- bf16 mixed-precision path (perf default): loose tolerance ----
    codes16, dec16 = ae_forward(x, params)  # compute_dtype=bf16
    jax.block_until_ready((codes16, dec16))
    assert jnp.allclose(codes16, ref_codes, atol=3e-2, rtol=3e-2)
    assert jnp.allclose(dec16, ref_decoded, atol=3e-2, rtol=3e-2)

    # ---- multi-tile batch (exercises grid > 1 and batch-tight tiling) ----
    batch2 = 40
    x2 = jax.random.normal(jax.random.PRNGKey(2), (batch2, data_dim), jnp.float32)
    ref_codes2, ref_decoded2 = ae_reference(x2, params)
    codes2, dec2 = ae_forward(x2, params, compute_dtype=jnp.float32)
    jax.block_until_ready((codes2, dec2))
    assert codes2.shape == (batch2, code_dim)
    assert dec2.shape == (batch2, data_dim)
    assert jnp.allclose(codes2, ref_codes2, atol=1e-5, rtol=1e-5)
    assert jnp.allclose(dec2, ref_decoded2, atol=1e-5, rtol=1e-5)

    print("KERNEL_OK")
</pallas_src>

<mosaic_0001>
module attributes {stable_mosaic.version = 11 : i64} {
  func.func @_ae_kernel(%arg0: i32, %arg1: memref<8x128xf32, #tpu.memory_space<vmem>>, %arg2: memref<128x64xf32, #tpu.memory_space<vmem>>, %arg3: memref<64x16xf32, #tpu.memory_space<vmem>>, %arg4: memref<16x4xf32, #tpu.memory_space<vmem>>, %arg5: memref<4x128xf32, #tpu.memory_space<vmem>>, %arg6: memref<128x4xf32, #tpu.memory_space<vmem>>, %arg7: memref<4x16xf32, #tpu.memory_space<vmem>>, %arg8: memref<16x64xf32, #tpu.memory_space<vmem>>, %arg9: memref<64x128xf32, #tpu.memory_space<vmem>>, %arg10: memref<8x128xf32, #tpu.memory_space<vmem>>, %arg11: memref<8x128xf32, #tpu.memory_space<vmem>>, %arg12: memref<8x128xf32, #tpu.memory_space<vmem>>) attributes {dimension_semantics = [#tpu.dimension_semantics<parallel>], iteration_bounds = array<i64: 1>, scalar_prefetch = 0 : i64, scratch_operands = 0 : i64, tpu.core_type = #tpu.core_type<tc>, window_params = [{transform_indices = @transform_0, window_bounds = array<i64: 8, 128>}, {pipeline_mode = #tpu.pipeline_mode<synchronous>, transform_indices = @transform_1, window_bounds = array<i64: 128, 64>}, {pipeline_mode = #tpu.pipeline_mode<synchronous>, transform_indices = @transform_2, window_bounds = array<i64: 64, 16>}, {pipeline_mode = #tpu.pipeline_mode<synchronous>, transform_indices = @transform_3, window_bounds = array<i64: 16, 4>}, {pipeline_mode = #tpu.pipeline_mode<synchronous>, transform_indices = @transform_4, window_bounds = array<i64: 4, 128>}, {pipeline_mode = #tpu.pipeline_mode<synchronous>, transform_indices = @transform_5, window_bounds = array<i64: 128, 4>}, {pipeline_mode = #tpu.pipeline_mode<synchronous>, transform_indices = @transform_6, window_bounds = array<i64: 4, 16>}, {pipeline_mode = #tpu.pipeline_mode<synchronous>, transform_indices = @transform_7, window_bounds = array<i64: 16, 64>}, {pipeline_mode = #tpu.pipeline_mode<synchronous>, transform_indices = @transform_8, window_bounds = array<i64: 64, 128>}, {pipeline_mode = #tpu.pipeline_mode<synchronous>, transform_indices = @transform_9, window_bounds = array<i64: 8, 128>}, {transform_indices = @transform_10, window_bounds = array<i64: 8, 128>}, {transform_indices = @transform_11, window_bounds = array<i64: 8, 128>}]} {
    %c0 = arith.constant 0 : index
    %c0_0 = arith.constant 0 : index
    %0 = vector.load %arg1[%c0, %c0_0] : memref<8x128xf32, #tpu.memory_space<vmem>>, vector<8x128xf32>
    %c0_1 = arith.constant 0 : index
    %c0_2 = arith.constant 0 : index
    %1 = vector.load %arg2[%c0_1, %c0_2] : memref<128x64xf32, #tpu.memory_space<vmem>>, vector<128x64xf32>
    %cst = arith.constant dense<0.000000e+00> : vector<8x64xf32>
    %2 = tpu.matmul %0, %1, %cst {dimension_numbers = #tpu.dot_dimension_numbers<[1], [0], [0], [1], [0, 0, 1, 1], [], []>} : vector<8x128xf32>, vector<128x64xf32>, vector<8x64xf32> -> vector<8x64xf32>
    %c0_3 = arith.constant 0 : index
    %c0_4 = arith.constant 0 : index
    %3 = vector.load %arg10[%c0_3, %c0_4] : memref<8x128xf32, #tpu.memory_space<vmem>>, vector<1x64xf32>
    %4 = vector.broadcast %3 : vector<1x64xf32> to vector<8x64xf32>
    %5 = arith.addf %2, %4 : vector<8x64xf32>
    %cst_5 = arith.constant 0.000000e+00 : f32
    %cst_6 = arith.constant 6.000000e+00 : f32
    %6 = vector.broadcast %cst_5 : f32 to vector<8x64xf32>
    %7 = arith.maximumf %6, %5 : vector<8x64xf32>
    %8 = vector.broadcast %cst_6 : f32 to vector<8x64xf32>
    %9 = arith.minimumf %8, %7 : vector<8x64xf32>
    %c0_7 = arith.constant 0 : index
    %c0_8 = arith.constant 0 : index
    %10 = vector.load %arg3[%c0_7, %c0_8] : memref<64x16xf32, #tpu.memory_space<vmem>>, vector<64x16xf32>
    %cst_9 = arith.constant dense<0.000000e+00> : vector<8x16xf32>
    %11 = tpu.matmul %9, %10, %cst_9 {dimension_numbers = #tpu.dot_dimension_numbers<[1], [0], [0], [1], [0, 0, 1, 1], [], []>} : vector<8x64xf32>, vector<64x16xf32>, vector<8x16xf32> -> vector<8x16xf32>
    %c1 = arith.constant 1 : index
    %c0_10 = arith.constant 0 : index
    %12 = vector.load %arg10[%c1, %c0_10] : memref<8x128xf32, #tpu.memory_space<vmem>>, vector<1x16xf32>
    %13 = vector.broadcast %12 : vector<1x16xf32> to vector<8x16xf32>
    %14 = arith.addf %11, %13 : vector<8x16xf32>
    %cst_11 = arith.constant 0.000000e+00 : f32
    %cst_12 = arith.constant 6.000000e+00 : f32
    %15 = vector.broadcast %cst_11 : f32 to vector<8x16xf32>
    %16 = arith.maximumf %15, %14 : vector<8x16xf32>
    %17 = vector.broadcast %cst_12 : f32 to vector<8x16xf32>
    %18 = arith.minimumf %17, %16 : vector<8x16xf32>
    %c0_13 = arith.constant 0 : index
    %c0_14 = arith.constant 0 : index
    %19 = vector.load %arg4[%c0_13, %c0_14] : memref<16x4xf32, #tpu.memory_space<vmem>>, vector<16x4xf32>
    %cst_15 = arith.constant dense<0.000000e+00> : vector<8x4xf32>
    %20 = tpu.matmul %18, %19, %cst_15 {dimension_numbers = #tpu.dot_dimension_numbers<[1], [0], [0], [1], [0, 0, 1, 1], [], []>} : vector<8x16xf32>, vector<16x4xf32>, vector<8x4xf32> -> vector<8x4xf32>
    %c2 = arith.constant 2 : index
    %c0_16 = arith.constant 0 : index
    %21 = vector.load %arg10[%c2, %c0_16] : memref<8x128xf32, #tpu.memory_space<vmem>>, vector<1x4xf32>
    %22 = vector.broadcast %21 : vector<1x4xf32> to vector<8x4xf32>
    %23 = arith.addf %20, %22 : vector<8x4xf32>
    %cst_17 = arith.constant 0.000000e+00 : f32
    %cst_18 = arith.constant 6.000000e+00 : f32
    %24 = vector.broadcast %cst_17 : f32 to vector<8x4xf32>
    %25 = arith.maximumf %24, %23 : vector<8x4xf32>
    %26 = vector.broadcast %cst_18 : f32 to vector<8x4xf32>
    %27 = arith.minimumf %26, %25 : vector<8x4xf32>
    %c0_19 = arith.constant 0 : index
    %c0_20 = arith.constant 0 : index
    %28 = vector.load %arg5[%c0_19, %c0_20] : memref<4x128xf32, #tpu.memory_space<vmem>>, vector<4x128xf32>
    %cst_21 = arith.constant dense<0.000000e+00> : vector<8x128xf32>
    %29 = tpu.matmul %27, %28, %cst_21 {dimension_numbers = #tpu.dot_dimension_numbers<[1], [0], [0], [1], [0, 0, 1, 1], [], []>} : vector<8x4xf32>, vector<4x128xf32>, vector<8x128xf32> -> vector<8x128xf32>
    %c3 = arith.constant 3 : index
    %c0_22 = arith.constant 0 : index
    %30 = vector.load %arg10[%c3, %c0_22] : memref<8x128xf32, #tpu.memory_space<vmem>>, vector<1x128xf32>
    %31 = vector.broadcast %30 : vector<1x128xf32> to vector<8x128xf32>
    %32 = arith.addf %29, %31 : vector<8x128xf32>
    %c0_23 = arith.constant 0 : index
    %c0_24 = arith.constant 0 : index
    %33 = vector.load %arg11[%c0_23, %c0_24] : memref<8x128xf32, #tpu.memory_space<vmem>>, vector<8x128xf32>
    tpu.vector_store %arg11[%c0_23, %c0_24], %32 {strides = array<i32>} : memref<8x128xf32, #tpu.memory_space<vmem>>, vector<8x128xf32>,
    %c0_25 = arith.constant 0 : index
    %c0_26 = arith.constant 0 : index
    %34 = vector.load %arg6[%c0_25, %c0_26] : memref<128x4xf32, #tpu.memory_space<vmem>>, vector<128x4xf32>
    %cst_27 = arith.constant dense<0.000000e+00> : vector<8x4xf32>
    %35 = tpu.matmul %32, %34, %cst_27 {dimension_numbers = #tpu.dot_dimension_numbers<[1], [0], [0], [1], [0, 0, 1, 1], [], []>} : vector<8x128xf32>, vector<128x4xf32>, vector<8x4xf32> -> vector<8x4xf32>
    %c4 = arith.constant 4 : index
    %c0_28 = arith.constant 0 : index
    %36 = vector.load %arg10[%c4, %c0_28] : memref<8x128xf32, #tpu.memory_space<vmem>>, vector<1x4xf32>
    %37 = vector.broadcast %36 : vector<1x4xf32> to vector<8x4xf32>
    %38 = arith.addf %35, %37 : vector<8x4xf32>
    %cst_29 = arith.constant 0.000000e+00 : f32
    %cst_30 = arith.constant 6.000000e+00 : f32
    %39 = vector.broadcast %cst_29 : f32 to vector<8x4xf32>
    %40 = arith.maximumf %39, %38 : vector<8x4xf32>
    %41 = vector.broadcast %cst_30 : f32 to vector<8x4xf32>
    %42 = arith.minimumf %41, %40 : vector<8x4xf32>
    %c0_31 = arith.constant 0 : index
    %c0_32 = arith.constant 0 : index
    %43 = vector.load %arg7[%c0_31, %c0_32] : memref<4x16xf32, #tpu.memory_space<vmem>>, vector<4x16xf32>
    %cst_33 = arith.constant dense<0.000000e+00> : vector<8x16xf32>
    %44 = tpu.matmul %42, %43, %cst_33 {dimension_numbers = #tpu.dot_dimension_numbers<[1], [0], [0], [1], [0, 0, 1, 1], [], []>} : vector<8x4xf32>, vector<4x16xf32>, vector<8x16xf32> -> vector<8x16xf32>
    %c5 = arith.constant 5 : index
    %c0_34 = arith.constant 0 : index
    %45 = vector.load %arg10[%c5, %c0_34] : memref<8x128xf32, #tpu.memory_space<vmem>>, vector<1x16xf32>
    %46 = vector.broadcast %45 : vector<1x16xf32> to vector<8x16xf32>
    %47 = arith.addf %44, %46 : vector<8x16xf32>
    %cst_35 = arith.constant 0.000000e+00 : f32
    %cst_36 = arith.constant 6.000000e+00 : f32
    %48 = vector.broadcast %cst_35 : f32 to vector<8x16xf32>
    %49 = arith.maximumf %48, %47 : vector<8x16xf32>
    %50 = vector.broadcast %cst_36 : f32 to vector<8x16xf32>
    %51 = arith.minimumf %50, %49 : vector<8x16xf32>
    %c0_37 = arith.constant 0 : index
    %c0_38 = arith.constant 0 : index
    %52 = vector.load %arg8[%c0_37, %c0_38] : memref<16x64xf32, #tpu.memory_space<vmem>>, vector<16x64xf32>
    %cst_39 = arith.constant dense<0.000000e+00> : vector<8x64xf32>
    %53 = tpu.matmul %51, %52, %cst_39 {dimension_numbers = #tpu.dot_dimension_numbers<[1], [0], [0], [1], [0, 0, 1, 1], [], []>} : vector<8x16xf32>, vector<16x64xf32>, vector<8x64xf32> -> vector<8x64xf32>
    %c6 = arith.constant 6 : index
    %c0_40 = arith.constant 0 : index
    %54 = vector.load %arg10[%c6, %c0_40] : memref<8x128xf32, #tpu.memory_space<vmem>>, vector<1x64xf32>
    %55 = vector.broadcast %54 : vector<1x64xf32> to vector<8x64xf32>
    %56 = arith.addf %53, %55 : vector<8x64xf32>
    %cst_41 = arith.constant 0.000000e+00 : f32
    %cst_42 = arith.constant 6.000000e+00 : f32
    %57 = vector.broadcast %cst_41 : f32 to vector<8x64xf32>
    %58 = arith.maximumf %57, %56 : vector<8x64xf32>
    %59 = vector.broadcast %cst_42 : f32 to vector<8x64xf32>
    %60 = arith.minimumf %59, %58 : vector<8x64xf32>
    %c0_43 = arith.constant 0 : index
    %c0_44 = arith.constant 0 : index
    %61 = vector.load %arg9[%c0_43, %c0_44] : memref<64x128xf32, #tpu.memory_space<vmem>>, vector<64x128xf32>
    %cst_45 = arith.constant dense<0.000000e+00> : vector<8x128xf32>
    %62 = tpu.matmul %60, %61, %cst_45 {dimension_numbers = #tpu.dot_dimension_numbers<[1], [0], [0], [1], [0, 0, 1, 1], [], []>} : vector<8x64xf32>, vector<64x128xf32>, vector<8x128xf32> -> vector<8x128xf32>
    %c7 = arith.constant 7 : index
    %c0_46 = arith.constant 0 : index
    %63 = vector.load %arg10[%c7, %c0_46] : memref<8x128xf32, #tpu.memory_space<vmem>>, vector<1x128xf32>
    %64 = vector.broadcast %63 : vector<1x128xf32> to vector<8x128xf32>
    %65 = arith.addf %62, %64 : vector<8x128xf32>
    %c0_47 = arith.constant 0 : index
    %c0_48 = arith.constant 0 : index
    %66 = vector.load %arg12[%c0_47, %c0_48] : memref<8x128xf32, #tpu.memory_space<vmem>>, vector<8x128xf32>
    tpu.vector_store %arg12[%c0_47, %c0_48], %65 {strides = array<i32>} : memref<8x128xf32, #tpu.memory_space<vmem>>, vector<8x128xf32>,
    return
  }
  func.func @transform_0(%arg0: i32) -> (i32, i32) {
    %c0_i32 = arith.constant 0 : i32
    %c0_i32_0 = arith.constant 0 : i32
    return %arg0, %c0_i32 : i32, i32
  }
  func.func @transform_1(%arg0: i32) -> (i32, i32) {
    %c0_i32 = arith.constant 0 : i32
    %c0_i32_0 = arith.constant 0 : i32
    %c0_i32_1 = arith.constant 0 : i32
    return %c0_i32, %c0_i32_0 : i32, i32
  }
  func.func @transform_2(%arg0: i32) -> (i32, i32) {
    %c0_i32 = arith.constant 0 : i32
    %c0_i32_0 = arith.constant 0 : i32
    %c0_i32_1 = arith.constant 0 : i32
    return %c0_i32, %c0_i32_0 : i32, i32
  }
  func.func @transform_3(%arg0: i32) -> (i32, i32) {
    %c0_i32 = arith.constant 0 : i32
    %c0_i32_0 = arith.constant 0 : i32
    %c0_i32_1 = arith.constant 0 : i32
    return %c0_i32, %c0_i32_0 : i32, i32
  }
  func.func @transform_4(%arg0: i32) -> (i32, i32) {
    %c0_i32 = arith.constant 0 : i32
    %c0_i32_0 = arith.constant 0 : i32
    %c0_i32_1 = arith.constant 0 : i32
    return %c0_i32, %c0_i32_0 : i32, i32
  }
  func.func @transform_5(%arg0: i32) -> (i32, i32) {
    %c0_i32 = arith.constant 0 : i32
    %c0_i32_0 = arith.constant 0 : i32
    %c0_i32_1 = arith.constant 0 : i32
    return %c0_i32, %c0_i32_0 : i32, i32
  }
  func.func @transform_6(%arg0: i32) -> (i32, i32) {
    %c0_i32 = arith.constant 0 : i32
    %c0_i32_0 = arith.constant 0 : i32
    %c0_i32_1 = arith.constant 0 : i32
    return %c0_i32, %c0_i32_0 : i32, i32
  }
  func.func @transform_7(%arg0: i32) -> (i32, i32) {
    %c0_i32 = arith.constant 0 : i32
    %c0_i32_0 = arith.constant 0 : i32
    %c0_i32_1 = arith.constant 0 : i32
    return %c0_i32, %c0_i32_0 : i32, i32
  }
  func.func @transform_8(%arg0: i32) -> (i32, i32) {
    %c0_i32 = arith.constant 0 : i32
    %c0_i32_0 = arith.constant 0 : i32
    %c0_i32_1 = arith.constant 0 : i32
    return %c0_i32, %c0_i32_0 : i32, i32
  }
  func.func @transform_9(%arg0: i32) -> (i32, i32) {
    %c0_i32 = arith.constant 0 : i32
    %c0_i32_0 = arith.constant 0 : i32
    %c0_i32_1 = arith.constant 0 : i32
    return %c0_i32, %c0_i32_0 : i32, i32
  }
  func.func @transform_10(%arg0: i32) -> (i32, i32) {
    %c0_i32 = arith.constant 0 : i32
    %c0_i32_0 = arith.constant 0 : i32
    return %arg0, %c0_i32 : i32, i32
  }
  func.func @transform_11(%arg0: i32) -> (i32, i32) {
    %c0_i32 = arith.constant 0 : i32
    %c0_i32_0 = arith.constant 0 : i32
    return %arg0, %c0_i32 : i32, i32
  }
}

module attributes {stable_mosaic.version = 11 : i64} {
  func.func @_ae_kernel(%arg0: i32, %arg1: memref<8x128xf32, #tpu.memory_space<vmem>>, %arg2: memref<128x64xf32, #tpu.memory_space<vmem>>, %arg3: memref<64x16xf32, #tpu.memory_space<vmem>>, %arg4: memref<16x4xf32, #tpu.memory_space<vmem>>, %arg5: memref<4x128xf32, #tpu.memory_space<vmem>>, %arg6: memref<128x4xf32, #tpu.memory_space<vmem>>, %arg7: memref<4x16xf32, #tpu.memory_space<vmem>>, %arg8: memref<16x64xf32, #tpu.memory_space<vmem>>, %arg9: memref<64x128xf32, #tpu.memory_space<vmem>>, %arg10: memref<8x128xf32, #tpu.memory_space<vmem>>, %arg11: memref<8x128xf32, #tpu.memory_space<vmem>>, %arg12: memref<8x128xf32, #tpu.memory_space<vmem>>) attributes {dimension_semantics = [#tpu.dimension_semantics<parallel>], iteration_bounds = array<i64: 1>, scalar_prefetch = 0 : i64, scratch_operands = 0 : i64, tpu.core_type = #tpu.core_type<tc>, window_params = [{transform_indices = @transform_0, window_bounds = array<i64: 8, 128>}, {pipeline_mode = #tpu.pipeline_mode<synchronous>, transform_indices = @transform_1, window_bounds = array<i64: 128, 64>}, {pipeline_mode = #tpu.pipeline_mode<synchronous>, transform_indices = @transform_2, window_bounds = array<i64: 64, 16>}, {pipeline_mode = #tpu.pipeline_mode<synchronous>, transform_indices = @transform_3, window_bounds = array<i64: 16, 4>}, {pipeline_mode = #tpu.pipeline_mode<synchronous>, transform_indices = @transform_4, window_bounds = array<i64: 4, 128>}, {pipeline_mode = #tpu.pipeline_mode<synchronous>, transform_indices = @transform_5, window_bounds = array<i64: 128, 4>}, {pipeline_mode = #tpu.pipeline_mode<synchronous>, transform_indices = @transform_6, window_bounds = array<i64: 4, 16>}, {pipeline_mode = #tpu.pipeline_mode<synchronous>, transform_indices = @transform_7, window_bounds = array<i64: 16, 64>}, {pipeline_mode = #tpu.pipeline_mode<synchronous>, transform_indices = @transform_8, window_bounds = array<i64: 64, 128>}, {pipeline_mode = #tpu.pipeline_mode<synchronous>, transform_indices = @transform_9, window_bounds = array<i64: 8, 128>}, {transform_indices = @transform_10, window_bounds = array<i64: 8, 128>}, {transform_indices = @transform_11, window_bounds = array<i64: 8, 128>}]} {
    %c0 = arith.constant 0 : index
    %c0_0 = arith.constant 0 : index
    %0 = vector.load %arg1[%c0, %c0_0] : memref<8x128xf32, #tpu.memory_space<vmem>>, vector<8x128xf32>
    %c0_1 = arith.constant 0 : index
    %c0_2 = arith.constant 0 : index
    %1 = vector.load %arg2[%c0_1, %c0_2] : memref<128x64xf32, #tpu.memory_space<vmem>>, vector<128x64xf32>
    %cst = arith.constant dense<0.000000e+00> : vector<8x64xf32>
    %2 = tpu.matmul %0, %1, %cst {dimension_numbers = #tpu.dot_dimension_numbers<[1], [0], [0], [1], [0, 0, 1, 1], [], []>} : vector<8x128xf32>, vector<128x64xf32>, vector<8x64xf32> -> vector<8x64xf32>
    %c0_3 = arith.constant 0 : index
    %c0_4 = arith.constant 0 : index
    %3 = vector.load %arg10[%c0_3, %c0_4] : memref<8x128xf32, #tpu.memory_space<vmem>>, vector<1x64xf32>
    %4 = vector.broadcast %3 : vector<1x64xf32> to vector<8x64xf32>
    %5 = arith.addf %2, %4 : vector<8x64xf32>
    %cst_5 = arith.constant 0.000000e+00 : f32
    %cst_6 = arith.constant 6.000000e+00 : f32
    %6 = vector.broadcast %cst_5 : f32 to vector<8x64xf32>
    %7 = arith.maximumf %6, %5 : vector<8x64xf32>
    %8 = vector.broadcast %cst_6 : f32 to vector<8x64xf32>
    %9 = arith.minimumf %8, %7 : vector<8x64xf32>
    %c0_7 = arith.constant 0 : index
    %c0_8 = arith.constant 0 : index
    %10 = vector.load %arg3[%c0_7, %c0_8] : memref<64x16xf32, #tpu.memory_space<vmem>>, vector<64x16xf32>
    %cst_9 = arith.constant dense<0.000000e+00> : vector<8x16xf32>
    %11 = tpu.matmul %9, %10, %cst_9 {dimension_numbers = #tpu.dot_dimension_numbers<[1], [0], [0], [1], [0, 0, 1, 1], [], []>} : vector<8x64xf32>, vector<64x16xf32>, vector<8x16xf32> -> vector<8x16xf32>
    %c1 = arith.constant 1 : index
    %c0_10 = arith.constant 0 : index
    %12 = vector.load %arg10[%c1, %c0_10] : memref<8x128xf32, #tpu.memory_space<vmem>>, vector<1x16xf32>
    %13 = vector.broadcast %12 : vector<1x16xf32> to vector<8x16xf32>
    %14 = arith.addf %11, %13 : vector<8x16xf32>
    %cst_11 = arith.constant 0.000000e+00 : f32
    %cst_12 = arith.constant 6.000000e+00 : f32
    %15 = vector.broadcast %cst_11 : f32 to vector<8x16xf32>
    %16 = arith.maximumf %15, %14 : vector<8x16xf32>
    %17 = vector.broadcast %cst_12 : f32 to vector<8x16xf32>
    %18 = arith.minimumf %17, %16 : vector<8x16xf32>
    %c0_13 = arith.constant 0 : index
    %c0_14 = arith.constant 0 : index
    %19 = vector.load %arg4[%c0_13, %c0_14] : memref<16x4xf32, #tpu.memory_space<vmem>>, vector<16x4xf32>
    %cst_15 = arith.constant dense<0.000000e+00> : vector<8x4xf32>
    %20 = tpu.matmul %18, %19, %cst_15 {dimension_numbers = #tpu.dot_dimension_numbers<[1], [0], [0], [1], [0, 0, 1, 1], [], []>} : vector<8x16xf32>, vector<16x4xf32>, vector<8x4xf32> -> vector<8x4xf32>
    %c2 = arith.constant 2 : index
    %c0_16 = arith.constant 0 : index
    %21 = vector.load %arg10[%c2, %c0_16] : memref<8x128xf32, #tpu.memory_space<vmem>>, vector<1x4xf32>
    %22 = vector.broadcast %21 : vector<1x4xf32> to vector<8x4xf32>
    %23 = arith.addf %20, %22 : vector<8x4xf32>
    %cst_17 = arith.constant 0.000000e+00 : f32
    %cst_18 = arith.constant 6.000000e+00 : f32
    %24 = vector.broadcast %cst_17 : f32 to vector<8x4xf32>
    %25 = arith.maximumf %24, %23 : vector<8x4xf32>
    %26 = vector.broadcast %cst_18 : f32 to vector<8x4xf32>
    %27 = arith.minimumf %26, %25 : vector<8x4xf32>
    %c0_19 = arith.constant 0 : index
    %c0_20 = arith.constant 0 : index
    %28 = vector.load %arg5[%c0_19, %c0_20] : memref<4x128xf32, #tpu.memory_space<vmem>>, vector<4x128xf32>
    %cst_21 = arith.constant dense<0.000000e+00> : vector<8x128xf32>
    %29 = tpu.matmul %27, %28, %cst_21 {dimension_numbers = #tpu.dot_dimension_numbers<[1], [0], [0], [1], [0, 0, 1, 1], [], []>} : vector<8x4xf32>, vector<4x128xf32>, vector<8x128xf32> -> vector<8x128xf32>
    %c3 = arith.constant 3 : index
    %c0_22 = arith.constant 0 : index
    %30 = vector.load %arg10[%c3, %c0_22] : memref<8x128xf32, #tpu.memory_space<vmem>>, vector<1x128xf32>
    %31 = vector.broadcast %30 : vector<1x128xf32> to vector<8x128xf32>
    %32 = arith.addf %29, %31 : vector<8x128xf32>
    %c0_23 = arith.constant 0 : index
    %c0_24 = arith.constant 0 : index
    %33 = vector.load %arg11[%c0_23, %c0_24] : memref<8x128xf32, #tpu.memory_space<vmem>>, vector<8x128xf32>
    tpu.vector_store %arg11[%c0_23, %c0_24], %32 {strides = array<i32>} : memref<8x128xf32, #tpu.memory_space<vmem>>, vector<8x128xf32>,
    %c0_25 = arith.constant 0 : index
    %c0_26 = arith.constant 0 : index
    %34 = vector.load %arg6[%c0_25, %c0_26] : memref<128x4xf32, #tpu.memory_space<vmem>>, vector<128x4xf32>
    %cst_27 = arith.constant dense<0.000000e+00> : vector<8x4xf32>
    %35 = tpu.matmul %32, %34, %cst_27 {dimension_numbers = #tpu.dot_dimension_numbers<[1], [0], [0], [1], [0, 0, 1, 1], [], []>} : vector<8x128xf32>, vector<128x4xf32>, vector<8x4xf32> -> vector<8x4xf32>
    %c4 = arith.constant 4 : index
    %c0_28 = arith.constant 0 : index
    %36 = vector.load %arg10[%c4, %c0_28] : memref<8x128xf32, #tpu.memory_space<vmem>>, vector<1x4xf32>
    %37 = vector.broadcast %36 : vector<1x4xf32> to vector<8x4xf32>
    %38 = arith.addf %35, %37 : vector<8x4xf32>
    %cst_29 = arith.constant 0.000000e+00 : f32
    %cst_30 = arith.constant 6.000000e+00 : f32
    %39 = vector.broadcast %cst_29 : f32 to vector<8x4xf32>
    %40 = arith.maximumf %39, %38 : vector<8x4xf32>
    %41 = vector.broadcast %cst_30 : f32 to vector<8x4xf32>
    %42 = arith.minimumf %41, %40 : vector<8x4xf32>
    %c0_31 = arith.constant 0 : index
    %c0_32 = arith.constant 0 : index
    %43 = vector.load %arg7[%c0_31, %c0_32] : memref<4x16xf32, #tpu.memory_space<vmem>>, vector<4x16xf32>
    %cst_33 = arith.constant dense<0.000000e+00> : vector<8x16xf32>
    %44 = tpu.matmul %42, %43, %cst_33 {dimension_numbers = #tpu.dot_dimension_numbers<[1], [0], [0], [1], [0, 0, 1, 1], [], []>} : vector<8x4xf32>, vector<4x16xf32>, vector<8x16xf32> -> vector<8x16xf32>
    %c5 = arith.constant 5 : index
    %c0_34 = arith.constant 0 : index
    %45 = vector.load %arg10[%c5, %c0_34] : memref<8x128xf32, #tpu.memory_space<vmem>>, vector<1x16xf32>
    %46 = vector.broadcast %45 : vector<1x16xf32> to vector<8x16xf32>
    %47 = arith.addf %44, %46 : vector<8x16xf32>
    %cst_35 = arith.constant 0.000000e+00 : f32
    %cst_36 = arith.constant 6.000000e+00 : f32
    %48 = vector.broadcast %cst_35 : f32 to vector<8x16xf32>
    %49 = arith.maximumf %48, %47 : vector<8x16xf32>
    %50 = vector.broadcast %cst_36 : f32 to vector<8x16xf32>
    %51 = arith.minimumf %50, %49 : vector<8x16xf32>
    %c0_37 = arith.constant 0 : index
    %c0_38 = arith.constant 0 : index
    %52 = vector.load %arg8[%c0_37, %c0_38] : memref<16x64xf32, #tpu.memory_space<vmem>>, vector<16x64xf32>
    %cst_39 = arith.constant dense<0.000000e+00> : vector<8x64xf32>
    %53 = tpu.matmul %51, %52, %cst_39 {dimension_numbers = #tpu.dot_dimension_numbers<[1], [0], [0], [1], [0, 0, 1, 1], [], []>} : vector<8x16xf32>, vector<16x64xf32>, vector<8x64xf32> -> vector<8x64xf32>
    %c6 = arith.constant 6 : index
    %c0_40 = arith.constant 0 : index
    %54 = vector.load %arg10[%c6, %c0_40] : memref<8x128xf32, #tpu.memory_space<vmem>>, vector<1x64xf32>
    %55 = vector.broadcast %54 : vector<1x64xf32> to vector<8x64xf32>
    %56 = arith.addf %53, %55 : vector<8x64xf32>
    %cst_41 = arith.constant 0.000000e+00 : f32
    %cst_42 = arith.constant 6.000000e+00 : f32
    %57 = vector.broadcast %cst_41 : f32 to vector<8x64xf32>
    %58 = arith.maximumf %57, %56 : vector<8x64xf32>
    %59 = vector.broadcast %cst_42 : f32 to vector<8x64xf32>
    %60 = arith.minimumf %59, %58 : vector<8x64xf32>
    %c0_43 = arith.constant 0 : index
    %c0_44 = arith.constant 0 : index
    %61 = vector.load %arg9[%c0_43, %c0_44] : memref<64x128xf32, #tpu.memory_space<vmem>>, vector<64x128xf32>
    %cst_45 = arith.constant dense<0.000000e+00> : vector<8x128xf32>
    %62 = tpu.matmul %60, %61, %cst_45 {dimension_numbers = #tpu.dot_dimension_numbers<[1], [0], [0], [1], [0, 0, 1, 1], [], []>} : vector<8x64xf32>, vector<64x128xf32>, vector<8x128xf32> -> vector<8x128xf32>
    %c7 = arith.constant 7 : index
    %c0_46 = arith.constant 0 : index
    %63 = vector.load %arg10[%c7, %c0_46] : memref<8x128xf32, #tpu.memory_space<vmem>>, vector<1x128xf32>
    %64 = vector.broadcast %63 : vector<1x128xf32> to vector<8x128xf32>
    %65 = arith.addf %62, %64 : vector<8x128xf32>
    %c0_47 = arith.constant 0 : index
    %c0_48 = arith.constant 0 : index
    %66 = vector.load %arg12[%c0_47, %c0_48] : memref<8x128xf32, #tpu.memory_space<vmem>>, vector<8x128xf32>
    tpu.vector_store %arg12[%c0_47, %c0_48], %65 {strides = array<i32>} : memref<8x128xf32, #tpu.memory_space<vmem>>, vector<8x128xf32>,
    return
  }
  func.func @transform_0(%arg0: i32) -> (i32, i32) {
    %c0_i32 = arith.constant 0 : i32
    %c0_i32_0 = arith.constant 0 : i32
    return %arg0, %c0_i32 : i32, i32
  }
  func.func @transform_1(%arg0: i32) -> (i32, i32) {
    %c0_i32 = arith.constant 0 : i32
    %c0_i32_0 = arith.constant 0 : i32
    %c0_i32_1 = arith.constant 0 : i32
    return %c0_i32, %c0_i32_0 : i32, i32
  }
  func.func @transform_2(%arg0: i32) -> (i32, i32) {
    %c0_i32 = arith.constant 0 : i32
    %c0_i32_0 = arith.constant 0 : i32
    %c0_i32_1 = arith.constant 0 : i32
    return %c0_i32, %c0_i32_0 : i32, i32
  }
  func.func @transform_3(%arg0: i32) -> (i32, i32) {
    %c0_i32 = arith.constant 0 : i32
    %c0_i32_0 = arith.constant 0 : i32
    %c0_i32_1 = arith.constant 0 : i32
    return %c0_i32, %c0_i32_0 : i32, i32
  }
  func.func @transform_4(%arg0: i32) -> (i32, i32) {
    %c0_i32 = arith.constant 0 : i32
    %c0_i32_0 = arith.constant 0 : i32
    %c0_i32_1 = arith.constant 0 : i32
    return %c0_i32, %c0_i32_0 : i32, i32
  }
  func.func @transform_5(%arg0: i32) -> (i32, i32) {
    %c0_i32 = arith.constant 0 : i32
    %c0_i32_0 = arith.constant 0 : i32
    %c0_i32_1 = arith.constant 0 : i32
    return %c0_i32, %c0_i32_0 : i32, i32
  }
  func.func @transform_6(%arg0: i32) -> (i32, i32) {
    %c0_i32 = arith.constant 0 : i32
    %c0_i32_0 = arith.constant 0 : i32
    %c0_i32_1 = arith.constant 0 : i32
    return %c0_i32, %c0_i32_0 : i32, i32
  }
  func.func @transform_7(%arg0: i32) -> (i32, i32) {
    %c0_i32 = arith.constant 0 : i32
    %c0_i32_0 = arith.constant 0 : i32
    %c0_i32_1 = arith.constant 0 : i32
    return %c0_i32, %c0_i32_0 : i32, i32
  }
  func.func @transform_8(%arg0: i32) -> (i32, i32) {
    %c0_i32 = arith.constant 0 : i32
    %c0_i32_0 = arith.constant 0 : i32
    %c0_i32_1 = arith.constant 0 : i32
    return %c0_i32, %c0_i32_0 : i32, i32
  }
  func.func @transform_9(%arg0: i32) -> (i32, i32) {
    %c0_i32 = arith.constant 0 : i32
    %c0_i32_0 = arith.constant 0 : i32
    %c0_i32_1 = arith.constant 0 : i32
    return %c0_i32, %c0_i32_0 : i32, i32
  }
  func.func @transform_10(%arg0: i32) -> (i32, i32) {
    %c0_i32 = arith.constant 0 : i32
    %c0_i32_0 = arith.constant 0 : i32
    return %arg0, %c0_i32 : i32, i32
  }
  func.func @transform_11(%arg0: i32) -> (i32, i32) {
    %c0_i32 = arith.constant 0 : i32
    %c0_i32_0 = arith.constant 0 : i32
    return %arg0, %c0_i32 : i32, i32
  }
}

</mosaic_0001>

<bundles_post_ra>
// kernel: tpu_custom_call.1
= control target key start
LH: loop header
LB: loop body
LE: loop exit
PB: predicated region body
PF: predicated region fallthrough
CT: control target
= control target key end

     0   :  { %17 = vsyncpa [#allocation3], 0  ;;  %s679_s0 = inlined_call_operand.vmem [shape: f32[8,128], index: 0, kind: input, shape index: {}]   ;;  %s680_s1 = inlined_call_operand.vmem [shape: f32[128,64], index: 1, kind: input, shape index: {}]   ;;  %s681_s2 = inlined_call_operand.vmem [shape: f32[64,16], index: 2, kind: input, shape index: {}]   ;;  %s682_s3 = inlined_call_operand.vmem [shape: f32[16,4], index: 3, kind: input, shape index: {}]   ;;  %s683_s4 = inlined_call_operand.vmem [shape: f32[4,128], index: 4, kind: input, shape index: {}]   ;;  %s684_s5 = inlined_call_operand.vmem [shape: f32[128,4], index: 5, kind: input, shape index: {}]   ;;  %s685_s6 = inlined_call_operand.vmem [shape: f32[4,16], index: 6, kind: input, shape index: {}]   ;;  %s686_s7 = inlined_call_operand.vmem [shape: f32[16,64], index: 7, kind: input, shape index: {}]   ;;  %s687_s8 = inlined_call_operand.vmem [shape: f32[64,128], index: 8, kind: input, shape index: {}]   ;;  %s688_s9 = inlined_call_operand.vmem [shape: f32[8,128], index: 9, kind: input, shape index: {}]   ;;  %s689_s10 = inlined_call_operand.hbm [shape: f32[8,128], index: 10, kind: output, shape index: {0}]   ;;  %s690_s11 = inlined_call_operand.hbm [shape: f32[8,128], index: 11, kind: output, shape index: {1}]  }
   0x1   :  { %v55_v0 = vld [vmem:[%s680_s1 + $0x78] sm:$0xff]  ;;  %v54_v1 = vld [vmem:[%s680_s1 + $0x70] sm:$0xff]  ;;  %v53_v2 = vld [vmem:[%s680_s1 + $0x68] sm:$0xff] }
   0x2   :  { %58 = vmatpush.msra.mxu0 %v55_v0  ;;  %v52_v3 = vld [vmem:[%s680_s1 + $0x60] sm:$0xff]  ;;  %v51_v4 = vld [vmem:[%s680_s1 + $0x58] sm:$0xff]  ;;  %v50_v6 = vld [vmem:[%s680_s1 + $0x50] sm:$0xff] }
   0x3   :  { %v87_v5 = vld [vmem:[%s681_s2 + $0x38] sm:$0xff]  ;;  %v86_v7 = vld [vmem:[%s681_s2 + $0x30] sm:$0xff]  ;;  %v85_v8 = vld [vmem:[%s681_s2 + $0x28] sm:$0xff] }
   0x4   :  { %59 = vmatpush.msra.mxu0 %v54_v1  ;;  %102 = vmatpush.msra.mxu1 %v87_v5  ;;  %v84_v9 = vld [vmem:[%s681_s2 + $0x20] sm:$0xff]  ;;  %v49_v10 = vld [vmem:[%s680_s1 + $0x48] sm:$0xff] }
   0x6   :  { %60 = vmatpush.msra.mxu0 %v53_v2  ;;  %103 = vmatpush.msra.mxu1 %v86_v7 }
   0x8   :  { %61 = vmatpush.msra.mxu0 %v52_v3  ;;  %104 = vmatpush.msra.mxu1 %v85_v8 }
   0xa   :  { %62 = vmatpush.msra.mxu0 %v51_v4 }
   0xb   :  { %18 = vsyncpa [#allocation5], 0  ;;  %v48_v11 = vld [vmem:[%s680_s1 + $0x40] sm:$0xff]  ;;  %105 = vmatpush.msra.mxu1 %v84_v9  ;;  %v47_v12 = vld [vmem:[%s680_s1 + $0x38] sm:$0xff]  ;;  %vm90_vm0 = vcmask 523264   ;;  %vm153_vm1 = vcmask 1043456  }
   0xc   :  { %63 = vmatpush.msra.mxu0 %v50_v6  ;;  %v46_v13 = vld [vmem:[%s680_s1 + $0x30] sm:$0xff]  ;;  %v45_v14 = vld [vmem:[%s680_s1 + $0x28] sm:$0xff]  ;;  %v44_v15 = vld [vmem:[%s680_s1 + $0x20] sm:$0xff]  ;;  %vm120_vm2 = vcmask 130048   ;;  %vm149_vm3 = vcmask 31744   ;;  %s414_s27 = smov [#allocation2]  }
   0xd   :  { %v43_v16 = vld [vmem:[%s680_s1 + $0x18] sm:$0xff]  ;;  %v42_v17 = vld [vmem:[%s680_s1 + $0x10] sm:$0xff]  ;;  %v41_v18 = vld [vmem:[%s680_s1 + $0x8] sm:$0xff]  ;;  %s319_s29 = sshll.u32 %s689_s10, 4  ;;  %s415_s30 = smov [#allocation4]   ;;  %s320_s29 = int_to_ptr.hbm [resolvable:$true] %s319_s29 }
   0xe   :  { %64 = vmatpush.msra.mxu0 %v49_v10  ;;  %v40_v19 = vld [vmem:[%s680_s1] sm:$0xff]  ;;  %v83_v21 = vld [vmem:[%s681_s2 + $0x18] sm:$0xff]  ;;  %v82_v22 = vld [vmem:[%s681_s2 + $0x10] sm:$0xff]  ;;  %s328_s12 = sshll.u32 %s415_s30, 4  ;;  %s330_s14 = sshll.u32 %s690_s11, 4  ;;  %s329_s12 = int_to_ptr.vmem [resolvable:$true] %s328_s12  ;;  %s331_s14 = int_to_ptr.hbm [resolvable:$true] %s330_s14 }
   0xf   :  { %v39_v20 = vld [vmem:[%s679_s0] sm:$0xff]  ;;  %106 = vmatpush.msra.mxu1 %v83_v21  ;;  %v81_v23 = vld [vmem:[%s681_s2 + $0x8] sm:$0xff]  ;;  %v193_v38 = vld [vmem:[%s684_s5 + $0x78] sm:$0xff]  ;;  %s317_s0 = sshll.u32 %s414_s27, 4  ;;  %s318_s0 = int_to_ptr.vmem [resolvable:$true] %s317_s0 }
  0x10   :  { %65 = vmatpush.msra.mxu0 %v48_v11  ;;  %v80_v24 = vld [vmem:[%s681_s2] sm:$0xff]  ;;  %v117_v30 = vld [vmem:[%s682_s3 + $0x8] sm:$0xff]  ;;  %v192_v39 = vld [vmem:[%s684_s5 + $0x70] sm:$0xff]  ;;  %196 = vmatpush.msra.mxu3 %v193_v38 }
  0x11   :  { %107 = vmatpush.msra.mxu1 %v82_v22  ;;  %v354_v25 = vld [vmem:[%s688_s9] ss:$0 sm:$0xff]  ;;  %138 = vmatpush.msra.mxu2 %v117_v30  ;;  %v355_v33 = vld [vmem:[%s688_s9 + $0x1] ss:$0 sm:$0xff]  ;;  %v191_v40 = vld [vmem:[%s684_s5 + $0x68] sm:$0xff] }
  0x12   :  { %66 = vmatpush.msra.mxu0 %v47_v12  ;;  %v116_v31 = vld [vmem:[%s682_s3] sm:$0xff]  ;;  %197 = vmatpush.msra.mxu3 %v192_v39  ;;  %v189_v42 = vld [vmem:[%s684_s5 + $0x58] sm:$0xff]  ;;  %v188_v43 = vld [vmem:[%s684_s5 + $0x50] sm:$0xff] }
  0x13   :  { %108 = vmatpush.msra.mxu1 %v81_v23  ;;  %139 = vmatpush.msra.mxu2 %v116_v31  ;;  %v146_v32 = vld [vmem:[%s683_s4] sm:$0xf]  ;;  %v187_v44 = vld [vmem:[%s684_s5 + $0x48] sm:$0xff]  ;;  %v185_v46 = vld [vmem:[%s684_s5 + $0x38] sm:$0xff] }
  0x14   :  { %67 = vmatpush.msra.mxu0 %v46_v13  ;;  %v190_v41 = vld [vmem:[%s684_s5 + $0x60] sm:$0xff]  ;;  %198 = vmatpush.msra.mxu3 %v191_v40  ;;  %v184_v47 = vld [vmem:[%s684_s5 + $0x30] sm:$0xff]  ;;  %v183_v48 = vld [vmem:[%s684_s5 + $0x28] sm:$0xff] }
  0x15   :  { %109 = vmatpush.msra.mxu1 %v80_v24  ;;  %346 = vmatpush.msk.msrb.mxu2 %vm153_vm1, %v146_v32  ;;  %v186_v45 = vld [vmem:[%s684_s5 + $0x40] sm:$0xff]  ;;  %v181_v51 = vld [vmem:[%s684_s5 + $0x18] sm:$0xff]  ;;  %v180_v52 = vld [vmem:[%s684_s5 + $0x10] sm:$0xff] }
  0x16   :  { %68 = vmatpush.msra.mxu0 %v45_v14  ;;  %199 = vmatpush.msra.mxu3 %v190_v41  ;;  %v182_v49 = vld [vmem:[%s684_s5 + $0x20] sm:$0xff]  ;;  %v179_v57 = vld [vmem:[%s684_s5 + $0x8] sm:$0xff]  ;;  %v285_v6 = vld [vmem:[%s687_s8 + $0x38] sm:$0xff] }
  0x17   :  { %v356_v50 = vld [vmem:[%s688_s9 + $0x2] ss:$0 sm:$0xff]  ;;  %v357_v60 = vld [vmem:[%s688_s9 + $0x3] ss:$0 sm:$0xff]  ;;  %v250_v63 = vld [vmem:[%s686_s7 + $0x8] sm:$0xff]  ;;  %299 = vmatpush.msrb.mxu1 %v285_v6 }
  0x18   :  { %69 = vmatpush.msra.mxu0 %v44_v15  ;;  %200 = vmatpush.msra.mxu3 %v189_v42  ;;  %v178_v58 = vld [vmem:[%s684_s5] sm:$0xff]  ;;  %v284_v7 = vld [vmem:[%s687_s8 + $0x30] sm:$0xff]  ;;  %v283_v8 = vld [vmem:[%s687_s8 + $0x28] sm:$0xff] }
  0x19   :  { %v218_v59 = vld [vmem:[%s685_s6] sm:$0xf]  ;;  %v358_v0 = vld [vmem:[%s688_s9 + $0x4] ss:$0 sm:$0xff]  ;;  %300 = vmatpush.msrb.mxu1 %v284_v7  ;;  %v359_v10 = vld [vmem:[%s688_s9 + $0x5] ss:$0 sm:$0xff] }
  0x1a   :  { %70 = vmatpush.msra.mxu0 %v43_v16  ;;  %201 = vmatpush.msra.mxu3 %v188_v43  ;;  %v249_v5 = vld [vmem:[%s686_s7] sm:$0xff]  ;;  %v281_v15 = vld [vmem:[%s687_s8 + $0x18] sm:$0xff]  ;;  %v280_v16 = vld [vmem:[%s687_s8 + $0x10] sm:$0xff] }
  0x1b   :  { %v282_v9 = vld [vmem:[%s687_s8 + $0x20] sm:$0xff]  ;;  %301 = vmatpush.msrb.mxu1 %v283_v8 }
  0x1c   :  { %71 = vmatpush.msra.mxu0 %v42_v17  ;;  %202 = vmatpush.msra.mxu3 %v187_v44  ;;  %v279_v17 = vld [vmem:[%s687_s8 + $0x8] sm:$0xff]  ;;  %v361_v24 = vld [vmem:[%s688_s9 + $0x7] ss:$0 sm:$0xff] }
  0x1d   :  { %302 = vmatpush.msrb.mxu1 %v282_v9 }
  0x1e   :  { %72 = vmatpush.msra.mxu0 %v41_v18  ;;  %203 = vmatpush.msra.mxu3 %v186_v45  ;;  %v278_v18 = vld [vmem:[%s687_s8] sm:$0xff] }
  0x1f   :  { %303 = vmatpush.msrb.mxu1 %v281_v15 }
  0x20   :  { %73 = vmatpush.msra.mxu0 %v40_v19  ;;  %204 = vmatpush.msra.mxu3 %v185_v46  ;;  %v360_v19 = vld [vmem:[%s688_s9 + $0x6] ss:$0 sm:$0xff] }
  0x21   :  { %74 = vmatmul.f32.vlgmr.msra.gmra.mxu0 %v39_v20  ;;  %304 = vmatpush.msrb.mxu1 %v280_v16 }
  0x22   :  { %205 = vmatpush.msra.mxu3 %v184_v47 }
  0x23   :  { %305 = vmatpush.msrb.mxu1 %v279_v17 }
  0x24   :  { %206 = vmatpush.msra.mxu3 %v183_v48 }
  0x25   :  { %306 = vmatpush.msrb.mxu1 %v278_v18 }
  0x26   :  { %207 = vmatpush.msra.mxu3 %v182_v49 }
  0x28   :  { %208 = vmatpush.msra.mxu3 %v181_v51 }
  0x2a   :  { %209 = vmatpush.msra.mxu3 %v180_v52 }
  0x2c   :  { %210 = vmatpush.msra.mxu3 %v179_v57 }
  0x2e   :  { %211 = vmatpush.msra.mxu3 %v178_v58 }
  0x9e   :  { %v75_v26 = vpop.f32.mrf.mxu0 }
  0x9f   :  { %v76_v27 = vadd.f32 %v354_v25, %v75_v26 }
  0xa1   :  { %v78_v28 = vmax.f32 %v76_v27, 0.0 }
  0xa3   :  { %v79_v29 = vmin.f32 %v78_v28, 6.0 }
  0xa5   :  { %344 = vmatmul.msk.f32.vlgmr.msra.gmra.mxu1 %vm90_vm0, %v79_v29 }
 0x122   :  { %v111_v34 = vpop.f32.mrf.mxu1 }
 0x123   :  { %v112_v35 = vadd.f32 %v355_v33, %v111_v34 }
 0x125   :  { %v114_v36 = vmax.f32 %v112_v35, 0.0 }
 0x127   :  { %v115_v37 = vmin.f32 %v114_v36, 6.0 }
 0x129   :  { %345 = vmatmul.msk.f32.vlgmr.msra.gmra.mxu2 %vm120_vm2, %v115_v37 }
 0x12a   :  { %348 = vmatpush.msk.msra.mxu2 %vm153_vm1, %v218_v59 }
 0x1ac   :  { %v141_v53 = vpop.f32.mrf.mxu2 }
 0x1ad   :  { %v142_v54 = vadd.f32 %v356_v50, %v141_v53 }
 0x1af   :  { %v144_v55 = vmax.f32 %v142_v54, 0.0 }
 0x1b1   :  { %v145_v56 = vmin.f32 %v144_v55, 6.0 }
 0x1b3   :  { %347 = vmatmul.msk.f32.vlgmr.msrb.gmra.mxu2 %vm149_vm3, %v145_v56 }
 0x1b4   :  { %270 = vmatpush.msrb.mxu2 %v250_v63 }
 0x1b6   :  { %271 = vmatpush.msrb.mxu2 %v249_v5 }
 0x236   :  { %v174_v61 = vpop.f32.mrf.mxu2 }
 0x237   :  { %v175_v62 = vadd.f32 %v357_v60, %v174_v61 }
 0x239   :  { %177 = vst [vmem:[#allocation2] sm:$0xff] %v175_v62  ;;  %212 = vmatmul.f32.vlgmr.msra.gmra.mxu3 %v175_v62 }
 0x23a   :  { %322 = dma.vmem_to_hbm [thread:$0]  %s318_s0, 128, %s320_s29, [#allocation3]  }
 0x2bc   :  { %v213_v1 = vpop.f32.mrf.mxu3 }
 0x2bd   :  { %v214_v2 = vadd.f32 %v358_v0, %v213_v1 }
 0x2bf   :  { %v216_v3 = vmax.f32 %v214_v2, 0.0 }
 0x2c1   :  { %v217_v4 = vmin.f32 %v216_v3, 6.0 }
 0x2c3   :  { %349 = vmatmul.msk.f32.vlgmr.msra.gmra.mxu2 %vm149_vm3, %v217_v4 }
 0x346   :  { %v244_v11 = vpop.f32.mrf.mxu2 }
 0x347   :  { %v245_v12 = vadd.f32 %v359_v10, %v244_v11 }
 0x349   :  { %v247_v13 = vmax.f32 %v245_v12, 0.0 }
 0x34b   :  { %v248_v14 = vmin.f32 %v247_v13, 6.0 }
 0x34d   :  { %350 = vmatmul.msk.f32.vlgmr.msrb.gmra.mxu2 %vm120_vm2, %v248_v14 }
 0x3d0   :  { %v273_v20 = vpop.f32.mrf.mxu2 }
 0x3d1   :  { %v274_v21 = vadd.f32 %v360_v19, %v273_v20 }
 0x3d3   :  { %v276_v22 = vmax.f32 %v274_v21, 0.0 }
 0x3d5   :  { %v277_v23 = vmin.f32 %v276_v22, 6.0 }
 0x3d7   :  { %351 = vmatmul.msk.f32.vlgmr.msrb.gmra.mxu1 %vm90_vm0, %v277_v23 }
 0x454   :  { %v308_v25 = vpop.f32.mrf.mxu1 }
 0x455   :  { %v309_v26 = vadd.f32 %v361_v24, %v308_v25 }
 0x457   :  { %311 = vst [vmem:[#allocation4] sm:$0xff] %v309_v26 }
 0x458   :  { %333 = dma.vmem_to_hbm [thread:$0]  %s329_s12, 128, %s331_s14, [#allocation5]  }
 0x459   :  { %410 = dma.done.wait [#allocation3], 128  }
 0x45a   :  { %411 = vsyncadd [#allocation3], 4294967168 }
 0x45b   :  { %412 = dma.done.wait [#allocation5], 128  }
 0x45c   :  { %413 = vsyncadd [#allocation5], 4294967168 }
 0x45d   :  { %342 = vsyncpa [#allocation3], 1 }
 0x45e   :  { %343 = vsyncpa [#allocation5], 1 }

// kernel: tpu_custom_call.1
= control target key start
LH: loop header
LB: loop body
LE: loop exit
PB: predicated region body
PF: predicated region fallthrough
CT: control target
= control target key end

     0   :  { %17 = vsyncpa [#allocation3], 0  ;;  %s679_s0 = inlined_call_operand.vmem [shape: f32[8,128], index: 0, kind: input, shape index: {}]   ;;  %s680_s1 = inlined_call_operand.vmem [shape: f32[128,64], index: 1, kind: input, shape index: {}]   ;;  %s681_s2 = inlined_call_operand.vmem [shape: f32[64,16], index: 2, kind: input, shape index: {}]   ;;  %s682_s3 = inlined_call_operand.vmem [shape: f32[16,4], index: 3, kind: input, shape index: {}]   ;;  %s683_s4 = inlined_call_operand.vmem [shape: f32[4,128], index: 4, kind: input, shape index: {}]   ;;  %s684_s5 = inlined_call_operand.vmem [shape: f32[128,4], index: 5, kind: input, shape index: {}]   ;;  %s685_s6 = inlined_call_operand.vmem [shape: f32[4,16], index: 6, kind: input, shape index: {}]   ;;  %s686_s7 = inlined_call_operand.vmem [shape: f32[16,64], index: 7, kind: input, shape index: {}]   ;;  %s687_s8 = inlined_call_operand.vmem [shape: f32[64,128], index: 8, kind: input, shape index: {}]   ;;  %s688_s9 = inlined_call_operand.vmem [shape: f32[8,128], index: 9, kind: input, shape index: {}]   ;;  %s689_s10 = inlined_call_operand.hbm [shape: f32[8,128], index: 10, kind: output, shape index: {0}]   ;;  %s690_s11 = inlined_call_operand.hbm [shape: f32[8,128], index: 11, kind: output, shape index: {1}]  }
   0x1   :  { %v55_v0 = vld [vmem:[%s680_s1 + $0x78] sm:$0xff]  ;;  %v54_v1 = vld [vmem:[%s680_s1 + $0x70] sm:$0xff]  ;;  %v53_v2 = vld [vmem:[%s680_s1 + $0x68] sm:$0xff] }
   0x2   :  { %58 = vmatpush.msra.mxu0 %v55_v0  ;;  %v52_v3 = vld [vmem:[%s680_s1 + $0x60] sm:$0xff]  ;;  %v51_v4 = vld [vmem:[%s680_s1 + $0x58] sm:$0xff]  ;;  %v50_v6 = vld [vmem:[%s680_s1 + $0x50] sm:$0xff] }
   0x3   :  { %v87_v5 = vld [vmem:[%s681_s2 + $0x38] sm:$0xff]  ;;  %v86_v7 = vld [vmem:[%s681_s2 + $0x30] sm:$0xff]  ;;  %v85_v8 = vld [vmem:[%s681_s2 + $0x28] sm:$0xff] }
   0x4   :  { %59 = vmatpush.msra.mxu0 %v54_v1  ;;  %102 = vmatpush.msra.mxu1 %v87_v5  ;;  %v84_v9 = vld [vmem:[%s681_s2 + $0x20] sm:$0xff]  ;;  %v49_v10 = vld [vmem:[%s680_s1 + $0x48] sm:$0xff] }
   0x6   :  { %60 = vmatpush.msra.mxu0 %v53_v2  ;;  %103 = vmatpush.msra.mxu1 %v86_v7 }
   0x8   :  { %61 = vmatpush.msra.mxu0 %v52_v3  ;;  %104 = vmatpush.msra.mxu1 %v85_v8 }
   0xa   :  { %62 = vmatpush.msra.mxu0 %v51_v4 }
   0xb   :  { %18 = vsyncpa [#allocation5], 0  ;;  %v48_v11 = vld [vmem:[%s680_s1 + $0x40] sm:$0xff]  ;;  %105 = vmatpush.msra.mxu1 %v84_v9  ;;  %v47_v12 = vld [vmem:[%s680_s1 + $0x38] sm:$0xff]  ;;  %vm90_vm0 = vcmask 523264   ;;  %vm153_vm1 = vcmask 1043456  }
   0xc   :  { %63 = vmatpush.msra.mxu0 %v50_v6  ;;  %v46_v13 = vld [vmem:[%s680_s1 + $0x30] sm:$0xff]  ;;  %v45_v14 = vld [vmem:[%s680_s1 + $0x28] sm:$0xff]  ;;  %v44_v15 = vld [vmem:[%s680_s1 + $0x20] sm:$0xff]  ;;  %vm120_vm2 = vcmask 130048   ;;  %vm149_vm3 = vcmask 31744   ;;  %s414_s27 = smov [#allocation2]  }
   0xd   :  { %v43_v16 = vld [vmem:[%s680_s1 + $0x18] sm:$0xff]  ;;  %v42_v17 = vld [vmem:[%s680_s1 + $0x10] sm:$0xff]  ;;  %v41_v18 = vld [vmem:[%s680_s1 + $0x8] sm:$0xff]  ;;  %s319_s29 = sshll.u32 %s689_s10, 4  ;;  %s415_s30 = smov [#allocation4]   ;;  %s320_s29 = int_to_ptr.hbm [resolvable:$true] %s319_s29 }
   0xe   :  { %64 = vmatpush.msra.mxu0 %v49_v10  ;;  %v40_v19 = vld [vmem:[%s680_s1] sm:$0xff]  ;;  %v83_v21 = vld [vmem:[%s681_s2 + $0x18] sm:$0xff]  ;;  %v82_v22 = vld [vmem:[%s681_s2 + $0x10] sm:$0xff]  ;;  %s328_s12 = sshll.u32 %s415_s30, 4  ;;  %s330_s14 = sshll.u32 %s690_s11, 4  ;;  %s329_s12 = int_to_ptr.vmem [resolvable:$true] %s328_s12  ;;  %s331_s14 = int_to_ptr.hbm [resolvable:$true] %s330_s14 }
   0xf   :  { %v39_v20 = vld [vmem:[%s679_s0] sm:$0xff]  ;;  %106 = vmatpush.msra.mxu1 %v83_v21  ;;  %v81_v23 = vld [vmem:[%s681_s2 + $0x8] sm:$0xff]  ;;  %v193_v38 = vld [vmem:[%s684_s5 + $0x78] sm:$0xff]  ;;  %s317_s0 = sshll.u32 %s414_s27, 4  ;;  %s318_s0 = int_to_ptr.vmem [resolvable:$true] %s317_s0 }
  0x10   :  { %65 = vmatpush.msra.mxu0 %v48_v11  ;;  %v80_v24 = vld [vmem:[%s681_s2] sm:$0xff]  ;;  %v117_v30 = vld [vmem:[%s682_s3 + $0x8] sm:$0xff]  ;;  %v192_v39 = vld [vmem:[%s684_s5 + $0x70] sm:$0xff]  ;;  %196 = vmatpush.msra.mxu3 %v193_v38 }
  0x11   :  { %107 = vmatpush.msra.mxu1 %v82_v22  ;;  %v354_v25 = vld [vmem:[%s688_s9] ss:$0 sm:$0xff]  ;;  %138 = vmatpush.msra.mxu2 %v117_v30  ;;  %v355_v33 = vld [vmem:[%s688_s9 + $0x1] ss:$0 sm:$0xff]  ;;  %v191_v40 = vld [vmem:[%s684_s5 + $0x68] sm:$0xff] }
  0x12   :  { %66 = vmatpush.msra.mxu0 %v47_v12  ;;  %v116_v31 = vld [vmem:[%s682_s3] sm:$0xff]  ;;  %197 = vmatpush.msra.mxu3 %v192_v39  ;;  %v189_v42 = vld [vmem:[%s684_s5 + $0x58] sm:$0xff]  ;;  %v188_v43 = vld [vmem:[%s684_s5 + $0x50] sm:$0xff] }
  0x13   :  { %108 = vmatpush.msra.mxu1 %v81_v23  ;;  %139 = vmatpush.msra.mxu2 %v116_v31  ;;  %v146_v32 = vld [vmem:[%s683_s4] sm:$0xf]  ;;  %v187_v44 = vld [vmem:[%s684_s5 + $0x48] sm:$0xff]  ;;  %v185_v46 = vld [vmem:[%s684_s5 + $0x38] sm:$0xff] }
  0x14   :  { %67 = vmatpush.msra.mxu0 %v46_v13  ;;  %v190_v41 = vld [vmem:[%s684_s5 + $0x60] sm:$0xff]  ;;  %198 = vmatpush.msra.mxu3 %v191_v40  ;;  %v184_v47 = vld [vmem:[%s684_s5 + $0x30] sm:$0xff]  ;;  %v183_v48 = vld [vmem:[%s684_s5 + $0x28] sm:$0xff] }
  0x15   :  { %109 = vmatpush.msra.mxu1 %v80_v24  ;;  %346 = vmatpush.msk.msrb.mxu2 %vm153_vm1, %v146_v32  ;;  %v186_v45 = vld [vmem:[%s684_s5 + $0x40] sm:$0xff]  ;;  %v181_v51 = vld [vmem:[%s684_s5 + $0x18] sm:$0xff]  ;;  %v180_v52 = vld [vmem:[%s684_s5 + $0x10] sm:$0xff] }
  0x16   :  { %68 = vmatpush.msra.mxu0 %v45_v14  ;;  %199 = vmatpush.msra.mxu3 %v190_v41  ;;  %v182_v49 = vld [vmem:[%s684_s5 + $0x20] sm:$0xff]  ;;  %v179_v57 = vld [vmem:[%s684_s5 + $0x8] sm:$0xff]  ;;  %v285_v6 = vld [vmem:[%s687_s8 + $0x38] sm:$0xff] }
  0x17   :  { %v356_v50 = vld [vmem:[%s688_s9 + $0x2] ss:$0 sm:$0xff]  ;;  %v357_v60 = vld [vmem:[%s688_s9 + $0x3] ss:$0 sm:$0xff]  ;;  %v250_v63 = vld [vmem:[%s686_s7 + $0x8] sm:$0xff]  ;;  %299 = vmatpush.msrb.mxu1 %v285_v6 }
  0x18   :  { %69 = vmatpush.msra.mxu0 %v44_v15  ;;  %200 = vmatpush.msra.mxu3 %v189_v42  ;;  %v178_v58 = vld [vmem:[%s684_s5] sm:$0xff]  ;;  %v284_v7 = vld [vmem:[%s687_s8 + $0x30] sm:$0xff]  ;;  %v283_v8 = vld [vmem:[%s687_s8 + $0x28] sm:$0xff] }
  0x19   :  { %v218_v59 = vld [vmem:[%s685_s6] sm:$0xf]  ;;  %v358_v0 = vld [vmem:[%s688_s9 + $0x4] ss:$0 sm:$0xff]  ;;  %300 = vmatpush.msrb.mxu1 %v284_v7  ;;  %v359_v10 = vld [vmem:[%s688_s9 + $0x5] ss:$0 sm:$0xff] }
  0x1a   :  { %70 = vmatpush.msra.mxu0 %v43_v16  ;;  %201 = vmatpush.msra.mxu3 %v188_v43  ;;  %v249_v5 = vld [vmem:[%s686_s7] sm:$0xff]  ;;  %v281_v15 = vld [vmem:[%s687_s8 + $0x18] sm:$0xff]  ;;  %v280_v16 = vld [vmem:[%s687_s8 + $0x10] sm:$0xff] }
  0x1b   :  { %v282_v9 = vld [vmem:[%s687_s8 + $0x20] sm:$0xff]  ;;  %301 = vmatpush.msrb.mxu1 %v283_v8 }
  0x1c   :  { %71 = vmatpush.msra.mxu0 %v42_v17  ;;  %202 = vmatpush.msra.mxu3 %v187_v44  ;;  %v279_v17 = vld [vmem:[%s687_s8 + $0x8] sm:$0xff]  ;;  %v361_v24 = vld [vmem:[%s688_s9 + $0x7] ss:$0 sm:$0xff] }
  0x1d   :  { %302 = vmatpush.msrb.mxu1 %v282_v9 }
  0x1e   :  { %72 = vmatpush.msra.mxu0 %v41_v18  ;;  %203 = vmatpush.msra.mxu3 %v186_v45  ;;  %v278_v18 = vld [vmem:[%s687_s8] sm:$0xff] }
  0x1f   :  { %303 = vmatpush.msrb.mxu1 %v281_v15 }
  0x20   :  { %73 = vmatpush.msra.mxu0 %v40_v19  ;;  %204 = vmatpush.msra.mxu3 %v185_v46  ;;  %v360_v19 = vld [vmem:[%s688_s9 + $0x6] ss:$0 sm:$0xff] }
  0x21   :  { %74 = vmatmul.f32.vlgmr.msra.gmra.mxu0 %v39_v20  ;;  %304 = vmatpush.msrb.mxu1 %v280_v16 }
  0x22   :  { %205 = vmatpush.msra.mxu3 %v184_v47 }
  0x23   :  { %305 = vmatpush.msrb.mxu1 %v279_v17 }
  0x24   :  { %206 = vmatpush.msra.mxu3 %v183_v48 }
  0x25   :  { %306 = vmatpush.msrb.mxu1 %v278_v18 }
  0x26   :  { %207 = vmatpush.msra.mxu3 %v182_v49 }
  0x28   :  { %208 = vmatpush.msra.mxu3 %v181_v51 }
  0x2a   :  { %209 = vmatpush.msra.mxu3 %v180_v52 }
  0x2c   :  { %210 = vmatpush.msra.mxu3 %v179_v57 }
  0x2e   :  { %211 = vmatpush.msra.mxu3 %v178_v58 }
  0x9e   :  { %v75_v26 = vpop.f32.mrf.mxu0 }
  0x9f   :  { %v76_v27 = vadd.f32 %v354_v25, %v75_v26 }
  0xa1   :  { %v78_v28 = vmax.f32 %v76_v27, 0.0 }
  0xa3   :  { %v79_v29 = vmin.f32 %v78_v28, 6.0 }
  0xa5   :  { %344 = vmatmul.msk.f32.vlgmr.msra.gmra.mxu1 %vm90_vm0, %v79_v29 }
 0x122   :  { %v111_v34 = vpop.f32.mrf.mxu1 }
 0x123   :  { %v112_v35 = vadd.f32 %v355_v33, %v111_v34 }
 0x125   :  { %v114_v36 = vmax.f32 %v112_v35, 0.0 }
 0x127   :  { %v115_v37 = vmin.f32 %v114_v36, 6.0 }
 0x129   :  { %345 = vmatmul.msk.f32.vlgmr.msra.gmra.mxu2 %vm120_vm2, %v115_v37 }
 0x12a   :  { %348 = vmatpush.msk.msra.mxu2 %vm153_vm1, %v218_v59 }
 0x1ac   :  { %v141_v53 = vpop.f32.mrf.mxu2 }
 0x1ad   :  { %v142_v54 = vadd.f32 %v356_v50, %v141_v53 }
 0x1af   :  { %v144_v55 = vmax.f32 %v142_v54, 0.0 }
 0x1b1   :  { %v145_v56 = vmin.f32 %v144_v55, 6.0 }
 0x1b3   :  { %347 = vmatmul.msk.f32.vlgmr.msrb.gmra.mxu2 %vm149_vm3, %v145_v56 }
 0x1b4   :  { %270 = vmatpush.msrb.mxu2 %v250_v63 }
 0x1b6   :  { %271 = vmatpush.msrb.mxu2 %v249_v5 }
 0x236   :  { %v174_v61 = vpop.f32.mrf.mxu2 }
 0x237   :  { %v175_v62 = vadd.f32 %v357_v60, %v174_v61 }
 0x239   :  { %177 = vst [vmem:[#allocation2] sm:$0xff] %v175_v62  ;;  %212 = vmatmul.f32.vlgmr.msra.gmra.mxu3 %v175_v62 }
 0x23a   :  { %322 = dma.vmem_to_hbm [thread:$0]  %s318_s0, 128, %s320_s29, [#allocation3]  }
 0x2bc   :  { %v213_v1 = vpop.f32.mrf.mxu3 }
 0x2bd   :  { %v214_v2 = vadd.f32 %v358_v0, %v213_v1 }
 0x2bf   :  { %v216_v3 = vmax.f32 %v214_v2, 0.0 }
 0x2c1   :  { %v217_v4 = vmin.f32 %v216_v3, 6.0 }
 0x2c3   :  { %349 = vmatmul.msk.f32.vlgmr.msra.gmra.mxu2 %vm149_vm3, %v217_v4 }
 0x346   :  { %v244_v11 = vpop.f32.mrf.mxu2 }
 0x347   :  { %v245_v12 = vadd.f32 %v359_v10, %v244_v11 }
 0x349   :  { %v247_v13 = vmax.f32 %v245_v12, 0.0 }
 0x34b   :  { %v248_v14 = vmin.f32 %v247_v13, 6.0 }
 0x34d   :  { %350 = vmatmul.msk.f32.vlgmr.msrb.gmra.mxu2 %vm120_vm2, %v248_v14 }
 0x3d0   :  { %v273_v20 = vpop.f32.mrf.mxu2 }
 0x3d1   :  { %v274_v21 = vadd.f32 %v360_v19, %v273_v20 }
 0x3d3   :  { %v276_v22 = vmax.f32 %v274_v21, 0.0 }
 0x3d5   :  { %v277_v23 = vmin.f32 %v276_v22, 6.0 }
 0x3d7   :  { %351 = vmatmul.msk.f32.vlgmr.msrb.gmra.mxu1 %vm90_vm0, %v277_v23 }
 0x454   :  { %v308_v25 = vpop.f32.mrf.mxu1 }
 0x455   :  { %v309_v26 = vadd.f32 %v361_v24, %v308_v25 }
 0x457   :  { %311 = vst [vmem:[#allocation4] sm:$0xff] %v309_v26 }
 0x458   :  { %333 = dma.vmem_to_hbm [thread:$0]  %s329_s12, 128, %s331_s14, [#allocation5]  }
 0x459   :  { %410 = dma.done.wait [#allocation3], 128  }
 0x45a   :  { %411 = vsyncadd [#allocation3], 4294967168 }
 0x45b   :  { %412 = dma.done.wait [#allocation5], 128  }
 0x45c   :  { %413 = vsyncadd [#allocation5], 4294967168 }
 0x45d   :  { %342 = vsyncpa [#allocation3], 1 }
 0x45e   :  { %343 = vsyncpa [#allocation5], 1 }

</bundles_post_ra>
